<compile_context>
chip_gen: v6e
topology: v6e:2x2x1
jax: 0.10.0
libtpu: 0.0.40
codegen_flags: <defaults>
</compile_context>

<pallas_src>
import jax
import jax.numpy as jnp
from jax.experimental import pallas as pl
from jax.experimental.pallas import tpu as pltpu

EPS = 0.0003
CLAMP_MIN = 1.0
CLAMP_MAX = 1.5


def _make_conv_bn_clamp_kernel(mw, m_valid, m_pad, k=3, stride=2):
    """Build the kernel closure over the static layout constants.

    mw      = N * Wo      (lane offset of one output-row block in the f axis)
    m_valid = N * Ho * Wo (true number of output positions)
    m_pad   = lane-padded M (multiple of 128)
    """

    def kernel(xc_ref, wg_ref, params_ref, o_ref):
        # xc:     (stride, k*Cin, F) bf16, xc[ph, kw*Cin+ci, hq*mw + n*Wo + ow]
        #         = x_padded[n, ci, stride*hq + ph, stride*ow + kw]
        # wg:     (k, Cout, k*Cin)  bf16, wg[kh, co, kw*Cin+ci] = W[co, ci, kh, kw]
        # params: (Cout, 2)         f32, col 0 = gamma, col 1 = beta
        # o:      (Cout, m_pad)     f32, lane-dense output (m = oh*mw + n*Wo + ow)

        # Implicit GEMM: 3 accumulating matmuls, one per kernel row kh.
        # Each is (Cout, k*Cin) @ (k*Cin, m_pad) -- kw and Cin share the contraction.
        acc = None
        for kh in range(k):
            ph, dh = kh % stride, kh // stride
            xt = xc_ref[ph, :, dh * mw : dh * mw + m_pad]          # (k*Cin, m_pad)
            part = jnp.dot(wg_ref[kh], xt,
                           preferred_element_type=jnp.float32)     # (Cout, m_pad) f32
            acc = part if acc is None else acc + part

        # BatchNorm2d training-mode statistics over all (N, Ho, Wo) positions,
        # which is exactly the lane axis here.  Single pass (sum / sum-of-squares);
        # cross-lane reductions run on the XLU, off the VPU critical slot.
        inv_m = 1.0 / m_valid
        if m_pad != m_valid:
            mask = jax.lax.broadcasted_iota(jnp.int32, acc.shape, 1) < m_valid
            acc_v = jnp.where(mask, acc, 0.0)
        else:
            acc_v = acc
        s1 = jnp.sum(acc_v, axis=-1, keepdims=True)                # (Cout, 1)
        s2 = jnp.sum(acc_v * acc_v, axis=-1, keepdims=True)        # (Cout, 1)
        mean = s1 * inv_m
        # Clamp the single-pass variance at 0 so rsqrt can never see a slightly
        # negative value from f32 cancellation (only eps=3e-4 protects it otherwise).
        var = jnp.maximum(s2 * inv_m - mean * mean, 0.0)

        params = params_ref[...]                                   # (Cout, 2)
        gamma = params[:, 0:1]
        beta = params[:, 1:2]
        scale = gamma * jax.lax.rsqrt(var + EPS)                   # fold gamma once
        y = (acc - mean) * scale + beta

        # clamp(min=1.0) then clamp(max=1.5)
        y = jnp.minimum(jnp.maximum(y, CLAMP_MIN), CLAMP_MAX)
        o_ref[...] = y.astype(o_ref.dtype)

    return kernel


def _space_to_depth_taps(x_bf, k=3, stride=2, pad=1):
    """x_bf: (N, Cin, H, W) bf16 -> xc (stride, k*Cin, F) with
       xc[ph, kw*Cin+ci, hq*(N*Wo) + n*Wo + ow] = x_padded[n, ci, stride*hq+ph, stride*ow+kw]
    Only ~1.33x the input bytes (no 9x im2col duplication)."""
    N, Cin, H, W = x_bf.shape
    Ho = (H + 2 * pad - k) // stride + 1
    Wo = (W + 2 * pad - k) // stride + 1
    Hq = Ho + (k - 1) // stride                     # phase-grid rows needed (Ho + 1)
    xp = jnp.pad(x_bf, ((0, 0), (0, 0), (pad, pad), (pad, pad)))
    per_ph = []
    for ph in range(stride):
        per_kw = []
        for kw in range(k):
            sl = xp[:, :,
                    ph:ph + stride * Hq - 1:stride,
                    kw:kw + stride * Wo - 1:stride]        # (N, Cin, Hq, Wo)
            per_kw.append(sl.transpose(1, 2, 0, 3))        # (Cin, Hq, N, Wo)
        per_ph.append(jnp.stack(per_kw, axis=0))           # (k, Cin, Hq, N, Wo)
    xc = jnp.stack(per_ph, axis=0)                         # (stride, k, Cin, Hq, N, Wo)
    xc = xc.reshape(stride, k * Cin, Hq * N * Wo)          # (stride, k*Cin, F)
    return xc, Ho, Wo


def model_forward(x, conv_w, conv_b, bn_gamma, bn_beta):
    """x: (N, 16, H, W) NCHW float32 -> (N, 8, Ho, Wo) NCHW float32."""
    N, Cin, H, W = x.shape
    Cout, _, k, _ = conv_w.shape
    stride, pad = 2, 1

    # Cast to bf16 first (operate on 1x bytes), then one cheap space-to-depth pass.
    x_bf = x.astype(jnp.bfloat16)
    xc, Ho, Wo = _space_to_depth_taps(x_bf, k=k, stride=stride, pad=pad)

    mw = N * Wo                      # lanes per output row block
    m_valid = N * Ho * Wo            # true number of output positions
    m_pad = ((m_valid + 127) // 128) * 128   # lane-dense, unmasked stores
    f_needed = (k // stride) * mw + m_pad
    if xc.shape[-1] < f_needed:
        xc = jnp.pad(xc, ((0, 0), (0, 0), (0, f_needed - xc.shape[-1])))

    # Per-kernel-row weight slabs: wg[kh, co, kw*Cin+ci] = conv_w[co, ci, kh, kw].
    wg = conv_w.transpose(2, 0, 3, 1).reshape(k, Cout, k * Cin).astype(jnp.bfloat16)

    # conv_b intentionally unused: a per-channel constant cancels exactly under the
    # train-mode BatchNorm batch-mean subtraction that follows the conv.
    _ = conv_b

    # gamma/beta merged into a single tiny input (one DMA instead of two).
    params = jnp.stack([bn_gamma, bn_beta], axis=1).astype(jnp.float32)  # (Cout, 2)

    cost = pl.CostEstimate(
        flops=2 * Cout * m_valid * (k * k * Cin),
        transcendentals=Cout,
        bytes_accessed=xc.size * 2 + wg.size * 2 + params.size * 4 + Cout * m_pad * 4,
    )

    kernel = _make_conv_bn_clamp_kernel(mw, m_valid, m_pad, k=k, stride=stride)

    # No grid / no pipelining: the whole problem is one VMEM tile, so a plain
    # pallas_call with whole-array blocks avoids the 1-point pipeline's fixed
    # overhead and 2x VMEM reservation.
    out_t = pl.pallas_call(
        kernel,
        out_shape=jax.ShapeDtypeStruct((Cout, m_pad), jnp.float32),
        cost_estimate=cost,
    )(xc, wg, params)

    # (Cout, M) with m = oh*(N*Wo) + n*Wo + ow  ->  (N, Cout, Ho, Wo).
    # TODO(synk): skip this transpose if downstream can consume the lane-dense layout.
    out = out_t[:, :m_valid].reshape(Cout, Ho, N, Wo).transpose(2, 0, 1, 3)
    return out


if __name__ == "__main__":
    key = jax.random.PRNGKey(0)
    k_x, k_w, k_b = jax.random.split(key, 3)

    N, Cin, H, W = 2, 16, 16, 16
    Cout, ksz = 8, 3

    x = jax.random.normal(k_x, (N, Cin, H, W), dtype=jnp.float32)

    # Deterministic "Conv2d" parameters (kaiming-uniform-like scaling).
    fan_in = Cin * ksz * ksz
    bound = 1.0 / (fan_in ** 0.5)
    conv_w = jax.random.uniform(k_w, (Cout, Cin, ksz, ksz),
                                minval=-bound, maxval=bound, dtype=jnp.float32)
    conv_b = jax.random.uniform(k_b, (Cout,),
                                minval=-bound, maxval=bound, dtype=jnp.float32)
    # BatchNorm2d default init: gamma=1, beta=0.
    bn_gamma = jnp.ones((Cout,), dtype=jnp.float32)
    bn_beta = jnp.zeros((Cout,), dtype=jnp.float32)

    fwd = jax.jit(model_forward)
    out = fwd(x, conv_w, conv_b, bn_gamma, bn_beta)
    jax.block_until_ready(out)
    assert out.shape == (N, Cout, H // 2, W // 2), out.shape

    # Pure-JAX reference (f32) for a sanity check of the forward semantics.
    ref_conv = jax.lax.conv_general_dilated(
        x, conv_w, window_strides=(2, 2), padding=((1, 1), (1, 1)),
        dimension_numbers=("NCHW", "OIHW", "NCHW")) + conv_b[None, :, None, None]
    r_mean = ref_conv.mean(axis=(0, 2, 3), keepdims=True)
    r_var = ref_conv.var(axis=(0, 2, 3), keepdims=True)
    ref = (ref_conv - r_mean) * jax.lax.rsqrt(r_var + EPS)
    ref = ref * bn_gamma[None, :, None, None] + bn_beta[None, :, None, None]
    ref = jnp.clip(ref, CLAMP_MIN, CLAMP_MAX)
    max_err = float(jnp.max(jnp.abs(out - ref)))
    assert max_err < 0.06, f"max abs error {max_err}"

    print("KERNEL_OK")
</pallas_src>

<mosaic_0001>
module attributes {stable_mosaic.version = 11 : i64} {
  func.func @kernel(%arg0: memref<2x48x144xbf16, #tpu.memory_space<vmem>>, %arg1: memref<3x8x48xbf16, #tpu.memory_space<vmem>>, %arg2: memref<8x2xf32, #tpu.memory_space<vmem>>, %arg3: memref<8x128xf32, #tpu.memory_space<vmem>>) attributes {dimension_semantics = [], scalar_prefetch = 0 : i64, scratch_operands = 0 : i64, tpu.core_type = #tpu.core_type<tc>} {
    %c0 = arith.constant 0 : index
    %c0_0 = arith.constant 0 : index
    %c0_1 = arith.constant 0 : index
    %0 = vector.load %arg0[%c0, %c0_0, %c0_1] : memref<2x48x144xbf16, #tpu.memory_space<vmem>>, vector<1x48x128xbf16>
    %1 = vector.shape_cast %0 : vector<1x48x128xbf16> to vector<48x128xbf16>
    %c0_2 = arith.constant 0 : index
    %c0_3 = arith.constant 0 : index
    %c0_4 = arith.constant 0 : index
    %2 = vector.load %arg1[%c0_2, %c0_3, %c0_4] : memref<3x8x48xbf16, #tpu.memory_space<vmem>>, vector<1x8x48xbf16>
    %3 = vector.shape_cast %2 : vector<1x8x48xbf16> to vector<8x48xbf16>
    %cst = arith.constant dense<0.000000e+00> : vector<8x128xf32>
    %4 = tpu.matmul %3, %1, %cst {dimension_numbers = #tpu.dot_dimension_numbers<[1], [0], [0], [1], [0, 0, 1, 1], [], []>} : vector<8x48xbf16>, vector<48x128xbf16>, vector<8x128xf32> -> vector<8x128xf32>
    %c1 = arith.constant 1 : index
    %c0_5 = arith.constant 0 : index
    %c0_6 = arith.constant 0 : index
    %5 = vector.load %arg0[%c1, %c0_5, %c0_6] : memref<2x48x144xbf16, #tpu.memory_space<vmem>>, vector<1x48x128xbf16>
    %6 = vector.shape_cast %5 : vector<1x48x128xbf16> to vector<48x128xbf16>
    %c1_7 = arith.constant 1 : index
    %c0_8 = arith.constant 0 : index
    %c0_9 = arith.constant 0 : index
    %7 = vector.load %arg1[%c1_7, %c0_8, %c0_9] : memref<3x8x48xbf16, #tpu.memory_space<vmem>>, vector<1x8x48xbf16>
    %8 = vector.shape_cast %7 : vector<1x8x48xbf16> to vector<8x48xbf16>
    %cst_10 = arith.constant dense<0.000000e+00> : vector<8x128xf32>
    %9 = tpu.matmul %8, %6, %cst_10 {dimension_numbers = #tpu.dot_dimension_numbers<[1], [0], [0], [1], [0, 0, 1, 1], [], []>} : vector<8x48xbf16>, vector<48x128xbf16>, vector<8x128xf32> -> vector<8x128xf32>
    %10 = arith.addf %4, %9 : vector<8x128xf32>
    %c0_11 = arith.constant 0 : index
    %c0_12 = arith.constant 0 : index
    %c16 = arith.constant 16 : index
    %11 = vector.load %arg0[%c0_11, %c0_12, %c16] : memref<2x48x144xbf16, #tpu.memory_space<vmem>>, vector<1x48x128xbf16>
    %12 = vector.shape_cast %11 : vector<1x48x128xbf16> to vector<48x128xbf16>
    %c2 = arith.constant 2 : index
    %c0_13 = arith.constant 0 : index
    %c0_14 = arith.constant 0 : index
    %13 = vector.load %arg1[%c2, %c0_13, %c0_14] : memref<3x8x48xbf16, #tpu.memory_space<vmem>>, vector<1x8x48xbf16>
    %14 = vector.shape_cast %13 : vector<1x8x48xbf16> to vector<8x48xbf16>
    %cst_15 = arith.constant dense<0.000000e+00> : vector<8x128xf32>
    %15 = tpu.matmul %14, %12, %cst_15 {dimension_numbers = #tpu.dot_dimension_numbers<[1], [0], [0], [1], [0, 0, 1, 1], [], []>} : vector<8x48xbf16>, vector<48x128xbf16>, vector<8x128xf32> -> vector<8x128xf32>
    %16 = arith.addf %10, %15 : vector<8x128xf32>
    %cst_16 = arith.constant dense<0.000000e+00> : vector<8xf32>
    %17 = vector.multi_reduction <add>, %16, %cst_16 [1] : vector<8x128xf32> to vector<8xf32>
    %18 = vector.shape_cast %17 : vector<8xf32> to vector<8x1xf32>
    %19 = arith.mulf %16, %16 : vector<8x128xf32>
    %cst_17 = arith.constant dense<0.000000e+00> : vector<8xf32>
    %20 = vector.multi_reduction <add>, %19, %cst_17 [1] : vector<8x128xf32> to vector<8xf32>
    %21 = vector.shape_cast %20 : vector<8xf32> to vector<8x1xf32>
    %cst_18 = arith.constant 7.812500e-03 : f32
    %22 = vector.broadcast %cst_18 : f32 to vector<8x1xf32>
    %23 = arith.mulf %18, %22 : vector<8x1xf32>
    %cst_19 = arith.constant 7.812500e-03 : f32
    %24 = vector.broadcast %cst_19 : f32 to vector<8x1xf32>
    %25 = arith.mulf %21, %24 : vector<8x1xf32>
    %26 = arith.mulf %23, %23 : vector<8x1xf32>
    %27 = arith.subf %25, %26 : vector<8x1xf32>
    %cst_20 = arith.constant 0.000000e+00 : f32
    %28 = vector.broadcast %cst_20 : f32 to vector<8x1xf32>
    %29 = arith.maximumf %27, %28 : vector<8x1xf32>
    %c0_21 = arith.constant 0 : index
    %c0_22 = arith.constant 0 : index
    %30 = vector.load %arg2[%c0_21, %c0_22] : memref<8x2xf32, #tpu.memory_space<vmem>>, vector<8x2xf32>
    %31 = vector.extract_strided_slice %30 {offsets = [0, 0], sizes = [8, 1], strides = [1, 1]} : vector<8x2xf32> to vector<8x1xf32>
    %32 = vector.extract_strided_slice %30 {offsets = [0, 1], sizes = [8, 1], strides = [1, 1]} : vector<8x2xf32> to vector<8x1xf32>
    %cst_23 = arith.constant 3.000000e-04 : f32
    %33 = vector.broadcast %cst_23 : f32 to vector<8x1xf32>
    %34 = arith.addf %29, %33 : vector<8x1xf32>
    %35 = math.rsqrt %34 : vector<8x1xf32>
    %36 = arith.mulf %31, %35 : vector<8x1xf32>
    %37 = vector.broadcast %23 : vector<8x1xf32> to vector<8x128xf32>
    %38 = arith.subf %16, %37 : vector<8x128xf32>
    %39 = vector.broadcast %36 : vector<8x1xf32> to vector<8x128xf32>
    %40 = arith.mulf %38, %39 : vector<8x128xf32>
    %41 = vector.broadcast %32 : vector<8x1xf32> to vector<8x128xf32>
    %42 = arith.addf %40, %41 : vector<8x128xf32>
    %cst_24 = arith.constant 1.000000e+00 : f32
    %43 = vector.broadcast %cst_24 : f32 to vector<8x128xf32>
    %44 = arith.maximumf %42, %43 : vector<8x128xf32>
    %cst_25 = arith.constant 1.500000e+00 : f32
    %45 = vector.broadcast %cst_25 : f32 to vector<8x128xf32>
    %46 = arith.minimumf %44, %45 : vector<8x128xf32>
    %c0_26 = arith.constant 0 : index
    %c0_27 = arith.constant 0 : index
    %47 = vector.load %arg3[%c0_26, %c0_27] : memref<8x128xf32, #tpu.memory_space<vmem>>, vector<8x128xf32>
    tpu.vector_store %arg3[%c0_26, %c0_27], %46 {strides = array<i32>} : memref<8x128xf32, #tpu.memory_space<vmem>>, vector<8x128xf32>,
    return
  }
}

</mosaic_0001>

<bundles_post_ra>
// kernel: model_forward.1
= control target key start
LH: loop header
LB: loop body
LE: loop exit
PB: predicated region body
PF: predicated region fallthrough
CT: control target
= control target key end

     0   :  { %v373_v1 = vmov 0.0   ;;  %vm374_vm0 = vmmov 0   ;;  %s375_s16 = smov 112   ;;  %vm49_vm1 = vcmask 392192   ;;  %vm198_vm2 = vcmask 916480   ;;  %s455_s0 = inlined_call_operand.vmem [shape: bf16[2,48,144], index: 0, kind: input, shape index: {}]   ;;  %s456_s1 = inlined_call_operand.vmem [shape: bf16[3,8,48], index: 1, kind: input, shape index: {}]   ;;  %s457_s2 = inlined_call_operand.vmem [shape: f32[8,2], index: 2, kind: input, shape index: {}]   ;;  %s458_s3 = inlined_call_operand.vmem [shape: f32[8,128], index: 3, kind: output, shape index: {}]  }
   0x1   :  { %v356_v0 = vld [vmem:[%s455_s0 + $0x20] ss:$8 sps:$4 sm:$0xff]   ;;  %318 = vmatprep.subr.bf16.mxu0 %v373_v1  ;;  %328 = vmatprep.subr.bf16.mxu1 %v373_v1  ;;  %v358_v2 = vld [vmem:[%s455_s0 + $0x24] ss:$8 sps:$4 sm:$0xff]   ;;  %v359_v3 = vld [vmem:[%s455_s0 + $0x10] ss:$8 sps:$4 sm:$0xff]  }
   0x2   :  { %324 = vmatprep.mubr.msk.bf16.mxu0 %vm374_vm0, %v373_v1  ;;  %334 = vmatprep.mubr.msk.bf16.mxu1 %vm374_vm0, %v373_v1  ;;  %v361_v4 = vld [vmem:[%s455_s0 + $0x14] ss:$8 sps:$4 sm:$0xff]   ;;  %v364_v5 = vld [vmem:[%s455_s0] ss:$8 sps:$4 sm:$0xff]   ;;  %v365_v6 = vld [vmem:[%s455_s0 + $0x50] ss:$8 sps:$4 sm:$0xff]  }
   0x3   :  { %194 = vrot.lane.b32.xlu0 %v356_v0, %s375_s16  ;;  %190 = vrot.lane.b32.xlu1 %v359_v3, %s375_s16  ;;  %v366_v7 = vld [vmem:[%s455_s0 + $0x40] ss:$8 sps:$4 sm:$0xff]   ;;  %v362_v9 = vld [vmem:[%s455_s0 + $0x4] ss:$8 sps:$4 sm:$0xff]   ;;  %v376_v40 = vmov 0   ;;  %v377_v42 = vmov 1  }
   0x4   :  { %319 = vmatpush3.bf16.msra.mxu0 %v365_v6  ;;  %v367_v8 = vld [vmem:[%s455_s0 + $0x20] ss:$8 sps:$4 sm:$0xff]   ;;  %v369_v10 = vld [vmem:[%s455_s0 + $0x10] ss:$8 sps:$4 sm:$0xff]   ;;  %v289_v13 = vld [vmem:[%s456_s1 + $0x4] sm:$0xf]  ;;  %353 = vset.pattern.permute.xlu0 %v376_v40 }
   0x5   :  { %320 = vmatprep.subr.bf16.mxu0 %v373_v1  ;;  %329 = vmatpush3.bf16.msra.mxu1 %v367_v8  ;;  %v368_v11 = vld [vmem:[%s455_s0 + $0x30] ss:$8 sps:$4 sm:$0xff]   ;;  %v370_v12 = vld [vmem:[%s455_s0] ss:$8 sps:$4 sm:$0xff]  }
   0x6   :  { %330 = vmatprep.subr.bf16.mxu1 %v373_v1  ;;  %v21_v14 = vld [vmem:[%s456_s1] sm:$0xf]  ;;  %v298_v24 = vld [vmem:[%s456_s1 + $0x8] sm:$0xf]  ;;  %354 = vset.pattern.permute.xlu1 %v377_v42 }
   0x7   :  { %196 = vrot.lane.b32.xlu0 %v358_v2, %s375_s16  ;;  %192 = vrot.lane.b32.xlu1 %v361_v4, %s375_s16  ;;  %v259_v41 = vld [vmem:[%s457_s2] sm:$0xff] }
   0x8   :  { %321 = vmatpush3.bf16.msra.mxu0 %v366_v7 }
   0x9   :  { %322 = vmatprep.subr.bf16.mxu0 %v373_v1  ;;  %331 = vmatpush3.bf16.msra.mxu1 %v369_v10 }
   0xa   :  { %332 = vmatprep.subr.bf16.mxu1 %v373_v1 }
   0xb   :  { %186 = vrot.lane.b32.xlu0 %v364_v5, %s375_s16  ;;  %188 = vrot.lane.b32.xlu1 %v362_v9, %s375_s16 }
   0xc   :  { %323 = vmatpush3.bf16.msra.mxu0 %v368_v11 }
   0xd   :  { %338 = vmatprep.subr.bf16.mxu0 %v373_v1  ;;  %333 = vmatpush3.bf16.msra.mxu1 %v370_v12 }
   0xf   :  { %325 = vmatmul.mubr.msk.bf16.vlgmr.msra.gmra.mxu0 %vm49_vm1, %v289_v13 }
  0x10   :  { %344 = vmatprep.mubr.msk.bf16.mxu0 %vm374_vm0, %v373_v1  ;;  %335 = vmatmul.mubr.msk.bf16.vlgmr.msra.gmra.mxu1 %vm49_vm1, %v21_v14 }
  0x75   :  { %v195_v15 = vpop.permute.xlu0 %194  ;;  %v191_v16 = vpop.permute.xlu1 %190 }
  0x79   :  { %v197_v17 = vpop.permute.xlu0 %196  ;;  %v193_v19 = vpop.permute.xlu1 %192 }
  0x7a   :  { %v201_v18 = vsel %vm198_vm2, %v195_v15, %v197_v17  ;;  %v200_v21 = vsel %vm198_vm2, %v191_v16, %v193_v19 }
  0x7b   :  { %339 = vmatpush3.bf16.msra.mxu0 %v201_v18 }
  0x7c   :  { %340 = vmatprep.subr.bf16.mxu0 %v373_v1 }
  0x7d   :  { %v187_v20 = vpop.permute.xlu0 %186  ;;  %v189_v22 = vpop.permute.xlu1 %188 }
  0x7e   :  { %v199_v23 = vsel %vm198_vm2, %v187_v20, %v189_v22 }
  0x7f   :  { %341 = vmatpush3.bf16.msra.mxu0 %v200_v21 }
  0x80   :  { %342 = vmatprep.subr.bf16.mxu0 %v373_v1 }
  0x83   :  { %343 = vmatpush3.bf16.msra.mxu0 %v199_v23 }
  0x86   :  { %345 = vmatmul.mubr.msk.bf16.vlgmr.msra.gmra.mxu0 %vm49_vm1, %v298_v24 }
  0xcf   :  { %v87_v25 = vpop.f32.mrf.mxu0 }
  0xd0   :  { %v148_v27 = vpop.f32.mrf.mxu1 }
  0xd1   :  { %v326_v26 = vpop.f32.mrf.mxu0  ;;  %v149_v28 = vadd.f32 %v148_v27, %v87_v25 }
  0xd2   :  { %v336_v30 = vpop.f32.mrf.mxu1 }
  0xd3   :  { %v90_v29 = vpop.f32.mrf.mxu0 }
  0xd4   :  { %v151_v32 = vpop.f32.mrf.mxu1 }
  0xd5   :  { %v327_v31 = vpop.f32.mrf.mxu0 }
  0xd6   :  { %v337_v33 = vpop.f32.mrf.mxu1 }
 0x146   :  { %v242_v34 = vpop.f32.mrf.mxu0 }
 0x147   :  { %v248_v35 = vadd.f32 %v242_v34, %v149_v28 }
 0x148   :  { %v346_v36 = vpop.f32.mrf.mxu0 }
 0x149   :  { %249 = vadd.xlane.f32.xlu0 %v248_v35  ;;  %v251_v37 = vmul.f32 %v248_v35, %v248_v35 }
 0x14a   :  { %v245_v38 = vpop.f32.mrf.mxu0 }
 0x14b   :  { %252 = vadd.xlane.f32.xlu1 %v251_v37 }
 0x14c   :  { %v347_v39 = vpop.f32.mrf.mxu0 }
 0x15c   :  { %272 = vperm.xlu1 %354, %v259_v41  }
 0x1d2   :  { %v250_v43 = vpop.xlane.xlu0 %249 }
 0x1d3   :  { %v254_v44 = vmul.f32 0.0078125, %v250_v43 }
 0x1d4   :  { %v253_v45 = vpop.xlane.xlu1 %252 }
 0x1d5   :  { %v256_v46 = vmul.f32 %v254_v44, %v254_v44  ;;  %v255_v47 = vmul.f32 0.0078125, %v253_v45  ;;  %v263_v53 = vsub.f32 %v248_v35, %v254_v44 }
 0x1d7   :  { %v257_v48 = vsub.f32 %v255_v47, %v256_v46 }
 0x1d8   :  { %v273_v55 = vpop.permute.xlu1 %272 }
 0x1d9   :  { %v258_v49 = vmax.f32 %v257_v48, 0.0 }
 0x1db   :  { %v260_v50 = vadd.f32 0.0003, %v258_v49 }
 0x1dd   :  { %371 = vrsqrt.f32 %v260_v50 }
 0x1ea   :  { %v372_v51 = vpop.eup %371 }
 0x1eb   :  { %v262_v52 = vmul.f32 %v372_v51, %v259_v41 }
 0x1ed   :  { %266 = vperm.xlu0 %353, %v262_v52  }
 0x1f1   :  { %355 = vset.pattern.permute.xlu0 %v377_v42 }
 0x268   :  { %v267_v54 = vpop.permute.xlu0 %266 }
 0x269   :  { %v269_v56 = vmul.f32 %v267_v54, %v263_v53 }
 0x26b   :  { %v275_v57 = vadd.f32 %v273_v55, %v269_v56 }
 0x26d   :  { %v276_v58 = vmax.f32 %v275_v57, 1.0 }
 0x26f   :  { %v277_v59 = vmin.f32 %v276_v58, 1.5 }
 0x271   :  { %278 = vst [vmem:[%s458_s3] sm:$0xff] %v277_v59 }

</bundles_post_ra>
